<compile_context>
chip_gen: v5e
topology: v5e:2x2
jax: 0.10.0
libtpu: 0.0.40
codegen_flags: <defaults>
</compile_context>

<pallas_src>
import functools

import jax
import jax.numpy as jnp
from jax.experimental import pallas as pl
from jax.experimental.pallas import tpu as pltpu

BN_EPS = 1e-5


def _bn_kernel(x_ref, g_ref, b_ref, o_ref, *, inv_n):
    x = x_ref[...].astype(jnp.float32)                 # (bs, Cb, T)

    # Single-pass batch statistics per channel: reduce over lanes (T) first,
    # then over the leading batch dimension.
    s1 = jnp.sum(x, axis=2, keepdims=True)             # (bs, Cb, 1)
    s2 = jnp.sum(x * x, axis=2, keepdims=True)         # (bs, Cb, 1)
    s1 = jnp.sum(s1, axis=0, keepdims=True)            # (1, Cb, 1)
    s2 = jnp.sum(s2, axis=0, keepdims=True)            # (1, Cb, 1)
    mean = s1 * inv_n
    var = s2 * inv_n - mean * mean                     # biased variance (BN)

    # Fold BN into one scale/shift per channel, then one FMA per element.
    scale = g_ref[...].astype(jnp.float32) * jax.lax.rsqrt(var + BN_EPS)
    shift = b_ref[...].astype(jnp.float32) - mean * scale
    o_ref[...] = (x * scale + shift).astype(o_ref.dtype)


def norm_data_pallas(x, gamma, beta):
    """x: (bs, c, 25, T) float32; gamma/beta: (c*25,). Returns (bs, c, 25, T)."""
    bs, c, J, T = x.shape
    C = c * J
    assert gamma.shape == (C,) and beta.shape == (C,)

    x3 = x.reshape(bs, C, T)          # free view, matches the PyTorch .view
    g3 = gamma.reshape(1, C, 1)
    b3 = beta.reshape(1, C, 1)

    # Channel tile: whole array (grid of 1) if it fits a conservative VMEM
    # budget (sized against v7x's 64 MiB physical / 32 MiB default-scoped VMEM
    # with double-buffered in+out blocks), else a sublane-aligned block.
    per_channel_bytes = bs * T * x.dtype.itemsize
    budget = 8 * 1024 * 1024
    cb_max = max(8, budget // (4 * per_channel_bytes))
    if C <= cb_max:
        cb = C
    else:
        cb = (cb_max // 8) * 8
    grid = (pl.cdiv(C, cb),)

    kernel = functools.partial(_bn_kernel, inv_n=1.0 / float(bs * T))

    out = pl.pallas_call(
        kernel,
        out_shape=jax.ShapeDtypeStruct((bs, C, T), x.dtype),
        grid_spec=pltpu.PrefetchScalarGridSpec(
            num_scalar_prefetch=0,
            grid=grid,
            in_specs=[
                pl.BlockSpec((bs, cb, T), lambda i: (0, i, 0)),
                pl.BlockSpec((1, cb, 1), lambda i: (0, i, 0)),
                pl.BlockSpec((1, cb, 1), lambda i: (0, i, 0)),
            ],
            out_specs=pl.BlockSpec((bs, cb, T), lambda i: (0, i, 0)),
        ),
        compiler_params=pltpu.CompilerParams(
            dimension_semantics=("parallel",)),
    )(x3, g3, b3)

    return out.reshape(bs, c, J, T)


def norm_data_reference(x, gamma, beta):
    """Pure-JAX reference mirroring the PyTorch forward (training-mode BN)."""
    bs, c, J, T = x.shape
    xf = x.reshape(bs, c * J, T)
    mean = jnp.mean(xf, axis=(0, 2), keepdims=True)
    var = jnp.mean((xf - mean) ** 2, axis=(0, 2), keepdims=True)
    xn = (xf - mean) / jnp.sqrt(var + BN_EPS)
    xn = xn * gamma[None, :, None] + beta[None, :, None]
    return xn.reshape(bs, c, J, T)


if __name__ == "__main__":
    # norm_data hardcodes 25 joints (BatchNorm1d(dim*25)); in model_CA_MSN it
    # normalizes 3-channel joint coordinates.
    bs, dim, joints, step = 2, 3, 25, 8

    key = jax.random.PRNGKey(0)
    kx, kg, kb = jax.random.split(key, 3)

    x = jax.random.normal(kx, (bs, dim, joints, step), dtype=jnp.float32)
    gamma = 1.0 + 0.1 * jax.random.normal(kg, (dim * joints,), dtype=jnp.float32)
    beta = 0.1 * jax.random.normal(kb, (dim * joints,), dtype=jnp.float32)

    fn = jax.jit(norm_data_pallas)
    out = jax.block_until_ready(fn(x, gamma, beta))

    ref = norm_data_reference(x, gamma, beta)
    assert out.shape == x.shape, out.shape
    max_err = float(jnp.max(jnp.abs(out - ref)))
    assert jnp.allclose(out, ref, atol=1e-4, rtol=1e-4), max_err

    print("KERNEL_OK")
</pallas_src>

<mosaic_0001>
module attributes {stable_mosaic.version = 11 : i64} {
  func.func @_bn_kernel(%arg0: i32, %arg1: memref<2x75x8xf32, #tpu.memory_space<vmem>>, %arg2: memref<1x75x1xf32, #tpu.memory_space<vmem>>, %arg3: memref<1x75x1xf32, #tpu.memory_space<vmem>>, %arg4: memref<2x75x8xf32, #tpu.memory_space<vmem>>) attributes {dimension_semantics = [#tpu.dimension_semantics<parallel>], iteration_bounds = array<i64: 1>, scalar_prefetch = 0 : i64, scratch_operands = 0 : i64, tpu.core_type = #tpu.core_type<tc>, window_params = [{transform_indices = @transform_0, window_bounds = array<i64: 2, 75, 8>}, {transform_indices = @transform_1, window_bounds = array<i64: 1, 75, 1>}, {transform_indices = @transform_2, window_bounds = array<i64: 1, 75, 1>}, {transform_indices = @transform_3, window_bounds = array<i64: 2, 75, 8>}]} {
    %c0 = arith.constant 0 : index
    %c0_0 = arith.constant 0 : index
    %c0_1 = arith.constant 0 : index
    %0 = vector.load %arg1[%c0, %c0_0, %c0_1] : memref<2x75x8xf32, #tpu.memory_space<vmem>>, vector<2x75x8xf32>
    %cst = arith.constant dense<0.000000e+00> : vector<2x75xf32>
    %1 = vector.multi_reduction <add>, %0, %cst [2] : vector<2x75x8xf32> to vector<2x75xf32>
    %2 = vector.shape_cast %1 : vector<2x75xf32> to vector<2x75x1xf32>
    %3 = arith.mulf %0, %0 : vector<2x75x8xf32>
    %cst_2 = arith.constant dense<0.000000e+00> : vector<2x75xf32>
    %4 = vector.multi_reduction <add>, %3, %cst_2 [2] : vector<2x75x8xf32> to vector<2x75xf32>
    %5 = vector.shape_cast %4 : vector<2x75xf32> to vector<2x75x1xf32>
    %cst_3 = arith.constant dense<0.000000e+00> : vector<75x1xf32>
    %6 = vector.multi_reduction <add>, %2, %cst_3 [0] : vector<2x75x1xf32> to vector<75x1xf32>
    %7 = vector.shape_cast %6 : vector<75x1xf32> to vector<1x75x1xf32>
    %cst_4 = arith.constant dense<0.000000e+00> : vector<75x1xf32>
    %8 = vector.multi_reduction <add>, %5, %cst_4 [0] : vector<2x75x1xf32> to vector<75x1xf32>
    %9 = vector.shape_cast %8 : vector<75x1xf32> to vector<1x75x1xf32>
    %cst_5 = arith.constant 6.250000e-02 : f32
    %10 = vector.broadcast %cst_5 : f32 to vector<1x75x1xf32>
    %11 = arith.mulf %7, %10 : vector<1x75x1xf32>
    %cst_6 = arith.constant 6.250000e-02 : f32
    %12 = vector.broadcast %cst_6 : f32 to vector<1x75x1xf32>
    %13 = arith.mulf %9, %12 : vector<1x75x1xf32>
    %14 = arith.mulf %11, %11 : vector<1x75x1xf32>
    %15 = arith.subf %13, %14 : vector<1x75x1xf32>
    %c0_7 = arith.constant 0 : index
    %c0_8 = arith.constant 0 : index
    %c0_9 = arith.constant 0 : index
    %16 = vector.load %arg2[%c0_7, %c0_8, %c0_9] : memref<1x75x1xf32, #tpu.memory_space<vmem>>, vector<1x75x1xf32>
    %cst_10 = arith.constant 9.99999974E-6 : f32
    %17 = vector.broadcast %cst_10 : f32 to vector<1x75x1xf32>
    %18 = arith.addf %15, %17 : vector<1x75x1xf32>
    %19 = math.rsqrt %18 : vector<1x75x1xf32>
    %20 = arith.mulf %16, %19 : vector<1x75x1xf32>
    %c0_11 = arith.constant 0 : index
    %c0_12 = arith.constant 0 : index
    %c0_13 = arith.constant 0 : index
    %21 = vector.load %arg3[%c0_11, %c0_12, %c0_13] : memref<1x75x1xf32, #tpu.memory_space<vmem>>, vector<1x75x1xf32>
    %22 = arith.mulf %11, %20 : vector<1x75x1xf32>
    %23 = arith.subf %21, %22 : vector<1x75x1xf32>
    %24 = vector.broadcast %20 : vector<1x75x1xf32> to vector<2x75x8xf32>
    %25 = arith.mulf %0, %24 : vector<2x75x8xf32>
    %26 = vector.broadcast %23 : vector<1x75x1xf32> to vector<2x75x8xf32>
    %27 = arith.addf %25, %26 : vector<2x75x8xf32>
    %c0_14 = arith.constant 0 : index
    %c0_15 = arith.constant 0 : index
    %c0_16 = arith.constant 0 : index
    %28 = vector.load %arg4[%c0_14, %c0_15, %c0_16] : memref<2x75x8xf32, #tpu.memory_space<vmem>>, vector<2x75x8xf32>
    tpu.vector_store %arg4[%c0_14, %c0_15, %c0_16], %27 {strides = array<i32>} : memref<2x75x8xf32, #tpu.memory_space<vmem>>, vector<2x75x8xf32>,
    return
  }
  func.func @transform_0(%arg0: i32) -> (i32, i32, i32) {
    %c0_i32 = arith.constant 0 : i32
    %c0_i32_0 = arith.constant 0 : i32
    %c0_i32_1 = arith.constant 0 : i32
    return %c0_i32, %arg0, %c0_i32_0 : i32, i32, i32
  }
  func.func @transform_1(%arg0: i32) -> (i32, i32, i32) {
    %c0_i32 = arith.constant 0 : i32
    %c0_i32_0 = arith.constant 0 : i32
    %c0_i32_1 = arith.constant 0 : i32
    return %c0_i32, %arg0, %c0_i32_0 : i32, i32, i32
  }
  func.func @transform_2(%arg0: i32) -> (i32, i32, i32) {
    %c0_i32 = arith.constant 0 : i32
    %c0_i32_0 = arith.constant 0 : i32
    %c0_i32_1 = arith.constant 0 : i32
    return %c0_i32, %arg0, %c0_i32_0 : i32, i32, i32
  }
  func.func @transform_3(%arg0: i32) -> (i32, i32, i32) {
    %c0_i32 = arith.constant 0 : i32
    %c0_i32_0 = arith.constant 0 : i32
    %c0_i32_1 = arith.constant 0 : i32
    return %c0_i32, %arg0, %c0_i32_0 : i32, i32, i32
  }
}

</mosaic_0001>

<bundles_post_ra>
// kernel: norm_data_pallas.1
= control target key start
LH: loop header
LB: loop body
LE: loop exit
PB: predicated region body
PF: predicated region fallthrough
CT: control target
= control target key end

     0   :  { %vm34_vm0 = vcmask 64512   ;;  %vm62_vm1 = vcmask 59392   ;;  %vm185_vm2 = vcmask 1042432   ;;  %s1189_s0 = inlined_call_operand.vmem [shape: f32[2,75,8], index: 0, kind: input, shape index: {}]   ;;  %s1190_s1 = inlined_call_operand.vmem [shape: f32[1,75,1], index: 1, kind: input, shape index: {}]   ;;  %s1191_s2 = inlined_call_operand.vmem [shape: f32[1,75,1], index: 2, kind: input, shape index: {}]   ;;  %s1192_s3 = inlined_call_operand.vmem [shape: f32[2,75,8], index: 3, kind: output, shape index: {}]  }
   0x1   :  { %v613_v0 = vld [vmem:[%s1189_s0 + $0x20] sm:$0xff]  ;;  %v618_v1 = vld [vmem:[%s1189_s0 + $0x10] sm:$0xff]  ;;  %v634_v6 = vld [vmem:[%s1189_s0 + $0x28] sm:$0xff] }
   0x2   :  { %v623_v2 = vld [vmem:[%s1189_s0] sm:$0xff]  ;;  %v47_v3 = vsel %vm34_vm0, %v613_v0, 0.0  ;;  %v41_v4 = vsel %vm34_vm0, %v618_v1, 0.0  ;;  %v639_v7 = vld [vmem:[%s1189_s0 + $0x18] sm:$0xff]  ;;  %v644_v8 = vld [vmem:[%s1189_s0 + $0x8] sm:$0xff]  ;;  %v50_v9 = vsel %vm34_vm0, %v634_v6, 0.0  ;;  %v98_v42 = vmul.f32 %v618_v1, %v618_v1 }
   0x3   :  { %v35_v5 = vsel %vm34_vm0, %v623_v2, 0.0  ;;  %48 = vadd.xlane.f32.xlu2 %v47_v3  ;;  %42 = vadd.xlane.f32.xlu1 %v41_v4  ;;  %v44_v10 = vsel %vm34_vm0, %v639_v7, 0.0  ;;  %v38_v11 = vsel %vm34_vm0, %v644_v8, 0.0  ;;  %v655_v12 = vld [vmem:[%s1189_s0 + $0x40] sm:$0xff]  ;;  %v660_v13 = vld [vmem:[%s1189_s0 + $0x38] sm:$0xff]  ;;  %v665_v14 = vld [vmem:[%s1189_s0 + $0x30] sm:$0xff]  ;;  %v96_v36 = vmul.f32 %v623_v2, %v623_v2 }
   0x4   :  { %36 = vadd.xlane.f32.xlu0 %v35_v5  ;;  %v59_v15 = vsel %vm34_vm0, %v655_v12, 0.0  ;;  %v56_v16 = vsel %vm34_vm0, %v660_v13, 0.0  ;;  %v53_v17 = vsel %vm34_vm0, %v665_v14, 0.0  ;;  %v676_v18 = vld [vmem:[%s1189_s0 + $0x58] sm:$0xff]  ;;  %v681_v19 = vld [vmem:[%s1189_s0 + $0x50] sm:$0xff]  ;;  %v702_v25 = vld [vmem:[%s1189_s0 + $0x68] sm:$0xff]  ;;  %v99_v43 = vmul.f32 %v639_v7, %v639_v7 }
   0x5   :  { %v686_v20 = vld [vmem:[%s1189_s0 + $0x48] sm:$0x7]  ;;  %v69_v21 = vsel %vm34_vm0, %v676_v18, 0.0  ;;  %v66_v22 = vsel %vm34_vm0, %v681_v19, 0.0  ;;  %v697_v24 = vld [vmem:[%s1189_s0 + $0x70] sm:$0xff]  ;;  %v707_v26 = vld [vmem:[%s1189_s0 + $0x60] sm:$0xff]  ;;  %v97_v44 = vmul.f32 %v644_v8, %v644_v8  ;;  %v101_v48 = vmul.f32 %v634_v6, %v634_v6 }
   0x6   :  { %v63_v23 = vsel %vm62_vm1, %v686_v20, 0.0  ;;  %v78_v27 = vsel %vm34_vm0, %v697_v24, 0.0  ;;  %v75_v28 = vsel %vm34_vm0, %v702_v25, 0.0  ;;  %v72_v29 = vsel %vm34_vm0, %v707_v26, 0.0  ;;  %v718_v30 = vld [vmem:[%s1189_s0 + $0x88] sm:$0xff]  ;;  %v723_v31 = vld [vmem:[%s1189_s0 + $0x80] sm:$0xff] }
   0x7   :  { %v728_v32 = vld [vmem:[%s1189_s0 + $0x78] sm:$0xff]  ;;  %v87_v33 = vsel %vm34_vm0, %v718_v30, 0.0  ;;  %v84_v34 = vsel %vm34_vm0, %v723_v31, 0.0  ;;  %v746_v38 = vld [vmem:[%s1189_s0 + $0x90] sm:$0xff]  ;;  %v116_v40 = vsel %vm34_vm0, %v96_v36, 0.0  ;;  %v122_v45 = vsel %vm34_vm0, %v98_v42, 0.0 }
   0x8   :  { %v81_v35 = vsel %vm34_vm0, %v728_v32, 0.0  ;;  %v741_v37 = vld [vmem:[%s1189_s0 + $0x98] sm:$0x7]  ;;  %v90_v41 = vsel %vm34_vm0, %v746_v38, 0.0  ;;  %v125_v46 = vsel %vm34_vm0, %v99_v43, 0.0  ;;  %v119_v47 = vsel %vm34_vm0, %v97_v44, 0.0 }
   0x9   :  { %v93_v39 = vsel %vm62_vm1, %v741_v37, 0.0  ;;  %v102_v49 = vmul.f32 %v665_v14, %v665_v14  ;;  %v100_v50 = vmul.f32 %v613_v0, %v613_v0  ;;  %v131_v51 = vsel %vm34_vm0, %v101_v48, 0.0 }
   0xa   :  { %v104_v54 = vmul.f32 %v655_v12, %v655_v12  ;;  %v105_v55 = vmul.f32 %v686_v20, %v686_v20  ;;  %v103_v56 = vmul.f32 %v660_v13, %v660_v13  ;;  %v107_v60 = vmul.f32 %v676_v18, %v676_v18 }
   0xb   :  { %51 = vadd.xlane.f32.xlu2 %v50_v9  ;;  %45 = vadd.xlane.f32.xlu1 %v44_v10  ;;  %v134_v52 = vsel %vm34_vm0, %v102_v49, 0.0  ;;  %v128_v53 = vsel %vm34_vm0, %v100_v50, 0.0  ;;  %v108_v61 = vmul.f32 %v707_v26, %v707_v26  ;;  %v106_v62 = vmul.f32 %v681_v19, %v681_v19 }
   0xc   :  { %39 = vadd.xlane.f32.xlu0 %v38_v11  ;;  %v140_v57 = vsel %vm34_vm0, %v104_v54, 0.0  ;;  %v143_v58 = vsel %vm62_vm1, %v105_v55, 0.0  ;;  %v137_v59 = vsel %vm34_vm0, %v103_v56, 0.0  ;;  %v149_v63 = vsel %vm34_vm0, %v107_v60, 0.0 }
   0xd   :  { %v152_v3 = vsel %vm34_vm0, %v108_v61, 0.0  ;;  %v146_v4 = vsel %vm34_vm0, %v106_v62, 0.0  ;;  %v110_v5 = vmul.f32 %v697_v24, %v697_v24  ;;  %v111_v9 = vmul.f32 %v728_v32, %v728_v32 }
   0xe   :  { %v109_v10 = vmul.f32 %v702_v25, %v702_v25 }
   0xf   :  { %v158_v11 = vsel %vm34_vm0, %v110_v5, 0.0 }
  0x13   :  { %60 = vadd.xlane.f32.xlu2 %v59_v15  ;;  %57 = vadd.xlane.f32.xlu1 %v56_v16  ;;  %v161_v15 = vsel %vm34_vm0, %v111_v9, 0.0  ;;  %v155_v16 = vsel %vm34_vm0, %v109_v10, 0.0 }
  0x14   :  { %54 = vadd.xlane.f32.xlu0 %v53_v17  ;;  %v113_v17 = vmul.f32 %v718_v30, %v718_v30 }
  0x1b   :  { %70 = vadd.xlane.f32.xlu2 %v69_v21  ;;  %67 = vadd.xlane.f32.xlu1 %v66_v22  ;;  %v114_v21 = vmul.f32 %v746_v38, %v746_v38  ;;  %v112_v22 = vmul.f32 %v723_v31, %v723_v31 }
  0x1c   :  { %64 = vadd.xlane.f32.xlu0 %v63_v23  ;;  %v167_v23 = vsel %vm34_vm0, %v113_v17, 0.0 }
  0x23   :  { %79 = vadd.xlane.f32.xlu2 %v78_v27  ;;  %76 = vadd.xlane.f32.xlu1 %v75_v28  ;;  %v170_v27 = vsel %vm34_vm0, %v114_v21, 0.0  ;;  %v164_v28 = vsel %vm34_vm0, %v112_v22, 0.0  ;;  %v589_v22 = vmov 0  }
  0x24   :  { %73 = vadd.xlane.f32.xlu0 %v72_v29  ;;  %v115_v29 = vmul.f32 %v741_v37, %v741_v37  ;;  %567 = vset.pattern.permute.xlu2 %v589_v22 }
  0x25   :  { %568 = vset.pattern.permute.xlu0 %v589_v22  ;;  %566 = vset.pattern.permute.xlu1 %v589_v22 }
  0x2b   :  { %88 = vadd.xlane.f32.xlu2 %v87_v33  ;;  %85 = vadd.xlane.f32.xlu1 %v84_v34  ;;  %v173_v33 = vsel %vm62_vm1, %v115_v29, 0.0 }
  0x2c   :  { %82 = vadd.xlane.f32.xlu0 %v81_v35 }
  0x33   :  { %94 = vadd.xlane.f32.xlu1 %v93_v39  ;;  %117 = vadd.xlane.f32.xlu2 %v116_v40 }
  0x34   :  { %91 = vadd.xlane.f32.xlu0 %v90_v41 }
  0x3b   :  { %123 = vadd.xlane.f32.xlu1 %v122_v45  ;;  %126 = vadd.xlane.f32.xlu2 %v125_v46 }
  0x3c   :  { %120 = vadd.xlane.f32.xlu0 %v119_v47 }
  0x43   :  { %132 = vadd.xlane.f32.xlu1 %v131_v51  ;;  %135 = vadd.xlane.f32.xlu2 %v134_v52 }
  0x44   :  { %129 = vadd.xlane.f32.xlu0 %v128_v53 }
  0x4b   :  { %141 = vadd.xlane.f32.xlu1 %v140_v57  ;;  %144 = vadd.xlane.f32.xlu2 %v143_v58 }
  0x4c   :  { %138 = vadd.xlane.f32.xlu0 %v137_v59 }
  0x53   :  { %150 = vadd.xlane.f32.xlu1 %v149_v63  ;;  %153 = vadd.xlane.f32.xlu2 %v152_v3 }
  0x54   :  { %147 = vadd.xlane.f32.xlu0 %v146_v4 }
  0x5b   :  { %159 = vadd.xlane.f32.xlu1 %v158_v11  ;;  %162 = vadd.xlane.f32.xlu2 %v161_v15 }
  0x5c   :  { %156 = vadd.xlane.f32.xlu0 %v155_v16 }
  0x63   :  { %168 = vadd.xlane.f32.xlu1 %v167_v23  ;;  %171 = vadd.xlane.f32.xlu2 %v170_v27 }
  0x64   :  { %165 = vadd.xlane.f32.xlu0 %v164_v28 }
  0x6c   :  { %174 = vadd.xlane.f32.xlu0 %v173_v33 }
  0x76   :  { %v49_v34 = vpop.xlane.xlu2 %48  ;;  %v43_v35 = vpop.xlane.xlu1 %42 }
  0x77   :  { %v37_v36 = vpop.xlane.xlu0 %36 }
  0x7e   :  { %v52_v39 = vpop.xlane.xlu2 %51  ;;  %v46_v40 = vpop.xlane.xlu1 %45 }
  0x7f   :  { %v40_v41 = vpop.xlane.xlu0 %39 }
  0x86   :  { %v810_v42 = vpop.xlane.xlu2 %60  ;;  %v58_v43 = vpop.xlane.xlu1 %57 }
  0x87   :  { %v812_v44 = vpop.xlane.xlu0 %54 }
  0x8e   :  { %v71_v45 = vpop.xlane.xlu2 %70  ;;  %v68_v46 = vpop.xlane.xlu1 %67 }
  0x8f   :  { %v65_v47 = vpop.xlane.xlu0 %64  ;;  %v177_v5 = vadd.f32 %v71_v45, %v40_v41  ;;  %v176_v10 = vadd.f32 %v68_v46, %v37_v36 }
  0x91   :  { %v824_v11 = vmul.f32 0.0625, %v177_v5  ;;  %v828_v16 = vmul.f32 0.0625, %v176_v10 }
  0x93   :  { %v222_v33 = vmul.f32 %v824_v11, %v824_v11 }
  0x96   :  { %v80_v48 = vpop.xlane.xlu2 %79  ;;  %v77_v49 = vpop.xlane.xlu1 %76 }
  0x97   :  { %v74_v50 = vpop.xlane.xlu0 %73  ;;  %v180_v23 = vadd.f32 %v80_v48, %v49_v34  ;;  %v179_v36 = vadd.f32 %v77_v49, %v46_v40 }
  0x98   :  { %v178_v9 = vadd.f32 %v74_v50, %v43_v35  ;;  %v221_v50 = vmul.f32 %v828_v16, %v828_v16 }
  0x99   :  { %v836_v34 = vmul.f32 0.0625, %v180_v23  ;;  %v838_v10 = vmul.f32 0.0625, %v179_v36  ;;  %v186_v23 = vsel %vm185_vm2, %v65_v47, 0.0 }
  0x9a   :  { %v826_v15 = vmul.f32 0.0625, %v178_v9 }
  0x9c   :  { %v223_v41 = vmul.f32 %v826_v15, %v826_v15 }
  0x9e   :  { %v89_v51 = vpop.xlane.xlu2 %88  ;;  %v86_v52 = vpop.xlane.xlu1 %85 }
  0x9f   :  { %v83_v53 = vpop.xlane.xlu0 %82  ;;  %v183_v49 = vadd.f32 %v89_v51, %v58_v43 }
  0xa0   :  { %v181_v5 = vadd.f32 %v83_v53, %v52_v39 }
  0xa1   :  { %v858_v36 = vmul.f32 0.0625, %v183_v49 }
  0xa6   :  { %v95_v54 = vpop.xlane.xlu1 %94  ;;  %v118_v55 = vpop.xlane.xlu2 %117 }
  0xa7   :  { %v814_v56 = vpop.xlane.xlu0 %91 }
  0xae   :  { %v124_v57 = vpop.xlane.xlu1 %123  ;;  %v127_v58 = vpop.xlane.xlu2 %126 }
  0xaf   :  { %v121_v59 = vpop.xlane.xlu0 %120 }
  0xb6   :  { %v133_v60 = vpop.xlane.xlu1 %132  ;;  %v816_v61 = vpop.xlane.xlu2 %135 }
  0xb7   :  { %v130_v62 = vpop.xlane.xlu0 %129 }
  0xbe   :  { %v818_v63 = vpop.xlane.xlu1 %141  ;;  %v820_v3 = vpop.xlane.xlu2 %144 }
  0xbf   :  { %v822_v4 = vpop.xlane.xlu0 %138 }
  0xc6   :  { %v151_v17 = vpop.xlane.xlu1 %150  ;;  %v154_v21 = vpop.xlane.xlu2 %153 }
  0xc7   :  { %v190_v27 = vadd.f32 %v151_v17, %v121_v59  ;;  %v191_v28 = vadd.f32 %v154_v21, %v124_v57  ;;  %v148_v29 = vpop.xlane.xlu0 %147  ;;  %v844_v17 = vmul.f32 0.0625, %v181_v5  ;;  %v187_v21 = vsel %vm185_vm2, %v95_v54, 0.0 }
  0xc8   :  { %v189_v35 = vadd.f32 %v148_v29, %v118_v55  ;;  %v224_v54 = vmul.f32 %v838_v10, %v838_v10 }
  0xc9   :  { %v212_v45 = vmul.f32 0.0625, %v190_v27  ;;  %v213_v46 = vmul.f32 0.0625, %v191_v28  ;;  %v225_v27 = vmul.f32 %v836_v34, %v836_v34 }
  0xca   :  { %v211_v9 = vmul.f32 0.0625, %v189_v35  ;;  %v188_v35 = vadd.f32 %v187_v21, %v186_v23 }
  0xcb   :  { %v232_v48 = vsub.f32 %v212_v45, %v222_v33  ;;  %v233_v57 = vsub.f32 %v213_v46, %v223_v41  ;;  %v182_v33 = vadd.f32 %v86_v52, %v812_v44  ;;  %v226_v41 = vmul.f32 %v844_v17, %v844_v17 }
  0xcc   :  { %v231_v59 = vsub.f32 %v211_v9, %v221_v50  ;;  %v184_v44 = vadd.f32 %v814_v56, %v810_v42  ;;  %v868_v5 = vmul.f32 0.0625, %v188_v35 }
  0xcd   :  { %v840_v55 = vadd.f32 1e-05, %v232_v48  ;;  %v842_v40 = vadd.f32 1e-05, %v233_v57  ;;  %v228_v57 = vmul.f32 %v858_v36, %v858_v36 }
  0xce   :  { %v847_v22 = vadd.f32 1e-05, %v231_v59  ;;  %v160_v39 = vpop.xlane.xlu1 %159  ;;  %v163_v53 = vpop.xlane.xlu2 %162 }
  0xcf   :  { %569 = vrsqrt.f32 %v840_v55  ;;  %v193_v28 = vadd.f32 %v160_v39, %v130_v62  ;;  %v157_v29 = vpop.xlane.xlu0 %156  ;;  %v194_v43 = vadd.f32 %v163_v53, %v133_v60  ;;  %v864_v60 = vmul.f32 0.0625, %v182_v33 }
  0xd0   :  { %571 = vrsqrt.f32 %v842_v40  ;;  %v192_v51 = vadd.f32 %v157_v29, %v127_v58  ;;  %v884_v39 = vmul.f32 0.0625, %v184_v44  ;;  %v198_v44 = vsel %vm185_vm2, %v820_v3, 0.0 }
  0xd1   :  { %573 = vrsqrt.f32 %v847_v22  ;;  %v215_v47 = vmul.f32 0.0625, %v193_v28  ;;  %v216_v62 = vmul.f32 0.0625, %v194_v43  ;;  %v227_v29 = vmul.f32 %v864_v60, %v864_v60 }
  0xd2   :  { %v214_v45 = vmul.f32 0.0625, %v192_v51  ;;  %v898_v51 = vmul.f32 %v868_v5, %v868_v5  ;;  %vm287_vm3 = vweird.f32 %v842_v40  ;;  %vm277_vm7 = vweird.f32 %v840_v55 }
  0xd3   :  { %v235_v52 = vsub.f32 %v215_v47, %v225_v27  ;;  %v236_v58 = vsub.f32 %v216_v62, %v226_v41  ;;  %vm267_vm8 = vweird.f32 %v847_v22 }
  0xd4   :  { %v234_v46 = vsub.f32 %v214_v45, %v224_v54  ;;  %v229_v45 = vmul.f32 %v884_v39, %v884_v39 }
  0xd5   :  { %v866_v50 = vpop.eup %569  ;;  %v870_v9 = vadd.f32 1e-05, %v235_v52  ;;  %v878_v42 = vadd.f32 1e-05, %v236_v58 }
  0xd6   :  { %v872_v48 = vpop.eup %571  ;;  %v272_v59 = vmul.f32 %v866_v50, %v840_v55  ;;  %v880_v56 = vadd.f32 1e-05, %v234_v46  ;;  %v169_v49 = vpop.xlane.xlu1 %168  ;;  %vm278_vm5 = vweird.f32 %v866_v50 }
  0xd7   :  { %v882_v21 = vpop.eup %573  ;;  %v282_v53 = vmul.f32 %v872_v48, %v842_v40  ;;  %575 = vrsqrt.f32 %v870_v9  ;;  %v196_v23 = vadd.f32 %v169_v49, %v822_v4  ;;  %v172_v27 = vpop.xlane.xlu2 %171  ;;  %vm288_vm4 = vweird.f32 %v872_v48  ;;  %vm279_vm9 = vmor %vm277_vm7, %vm278_vm5 }
  0xd8   :  { %v166_v28 = vpop.xlane.xlu0 %165  ;;  %v273_v33 = vmul.f32 %v866_v50, %v272_v59  ;;  %v262_v43 = vmul.f32 %v882_v21, %v847_v22  ;;  %577 = vrsqrt.f32 %v878_v42  ;;  %v197_v41 = vadd.f32 %v172_v27, %v818_v63  ;;  %vm937_vm6 = vmor %vm287_vm3, %vm288_vm4  ;;  %v244_v22 = vld [vmem:[%s1190_s1 + $0x18] sm:$0xff] }
  0xd9   :  { %v283_v54 = vmul.f32 %v872_v48, %v282_v53  ;;  %579 = vrsqrt.f32 %v880_v56  ;;  %v218_v4 = vmul.f32 0.0625, %v196_v23  ;;  %v195_v62 = vadd.f32 %v166_v28, %v816_v61 }
  0xda   :  { %v274_v35 = vmul.f32 0.5, %v273_v33  ;;  %v263_v47 = vmul.f32 %v882_v21, %v262_v43  ;;  %v219_v59 = vmul.f32 0.0625, %v197_v41  ;;  %vm268_vm10 = vweird.f32 %v882_v21 }
  0xdb   :  { %v284_v52 = vmul.f32 0.5, %v283_v54  ;;  %v238_v58 = vsub.f32 %v218_v4, %v228_v57  ;;  %v217_v49 = vmul.f32 0.0625, %v195_v62  ;;  %vm269_vm11 = vmor %vm267_vm8, %vm268_vm10  ;;  %vm297_vm14 = vweird.f32 %v880_v56 }
  0xdc   :  { %v264_v46 = vmul.f32 0.5, %v263_v47  ;;  %v275_v23 = vsub.f32 1.5, %v274_v35  ;;  %v239_v27 = vsub.f32 %v219_v59, %v229_v45  ;;  %vm307_vm15 = vweird.f32 %v870_v9 }
  0xdd   :  { %v910_v53 = vpop.eup %575  ;;  %v285_v33 = vsub.f32 1.5, %v284_v52  ;;  %v912_v63 = vadd.f32 1e-05, %v238_v58  ;;  %v237_v57 = vsub.f32 %v217_v49, %v227_v29  ;;  %vm317_vm5 = vweird.f32 %v878_v42 }
  0xde   :  { %v915_v61 = vpop.eup %577  ;;  %v302_v3 = vmul.f32 %v910_v53, %v870_v9  ;;  %v265_v43 = vsub.f32 1.5, %v264_v46  ;;  %v929_v62 = vadd.f32 1e-05, %v239_v27  ;;  %v243_v46 = vld [vmem:[%s1190_s1 + $0x10] sm:$0xff]  ;;  %v276_v49 = vmul.f32 %v866_v50, %v275_v23  ;;  %v245_v9 = vld [vmem:[%s1190_s1 + $0x20] sm:$0xff] }
  0xdf   :  { %v920_v28 = vpop.eup %579  ;;  %v312_v54 = vmul.f32 %v915_v61, %v878_v42  ;;  %581 = vrsqrt.f32 %v912_v63  ;;  %v286_v35 = vmul.f32 %v872_v48, %v285_v33  ;;  %v931_v29 = vadd.f32 1e-05, %v237_v57  ;;  %v247_v42 = vld [vmem:[%s1190_s1 + $0x30] sm:$0xff] }
  0xe0   :  { %v175_v4 = vpop.xlane.xlu0 %174  ;;  %v303_v47 = vmul.f32 %v910_v53, %v302_v3  ;;  %v292_v41 = vmul.f32 %v920_v28, %v880_v56  ;;  %583 = vrsqrt.f32 %v929_v62  ;;  %v242_v3 = vld [vmem:[%s1190_s1 + $0x8] sm:$0xff]  ;;  %v280_v57 = vsel %vm279_vm9, %v866_v50, %v276_v49 }
  0xe1   :  { %v313_v52 = vmul.f32 %v915_v61, %v312_v54  ;;  %v199_v58 = vsel %vm185_vm2, %v175_v4, 0.0  ;;  %v290_v59 = vsel %vm937_vm6, %v872_v48, %v286_v35  ;;  %585 = vrsqrt.f32 %v931_v29 }
  0xe2   :  { %v304_v40 = vmul.f32 0.5, %v303_v47  ;;  %v293_v33 = vmul.f32 %v920_v28, %v292_v41  ;;  %v200_v27 = vadd.f32 %v199_v58, %v198_v44  ;;  %v961_v23 = vmul.f32 %v290_v59, %v243_v46  ;;  %v241_v44 = vld [vmem:[%s1190_s1] sm:$0xff] }
  0xe3   :  { %v314_v4 = vmul.f32 0.5, %v313_v52  ;;  %v966_v47 = vmul.f32 %v280_v57, %v242_v3  ;;  %v266_v41 = vmul.f32 %v882_v21, %v265_v43  ;;  %vm308_vm12 = vweird.f32 %v910_v53 }
  0xe4   :  { %v305_v55 = vsub.f32 1.5, %v304_v40  ;;  %v294_v48 = vmul.f32 0.5, %v293_v33  ;;  %v220_v35 = vmul.f32 0.0625, %v200_v27  ;;  %413 = vperm.xlu0 %568, %v961_v23   ;;  %vm298_vm13 = vweird.f32 %v920_v28  ;;  %vm309_vm3 = vmor %vm307_vm15, %vm308_vm12 }
  0xe5   :  { %v964_v54 = vpop.eup %581  ;;  %408 = vperm.xlu2 %567, %v966_v47   ;;  %v270_v46 = vsel %vm269_vm11, %v882_v21, %v266_v41  ;;  %v315_v21 = vsub.f32 1.5, %v314_v4  ;;  %vm299_vm2 = vmor %vm297_vm14, %vm298_vm13  ;;  %vm318_vm4 = vweird.f32 %v915_v61  ;;  %vm327_vm7 = vweird.f32 %v931_v29 }
  0xe6   :  { %v295_v45 = vsub.f32 1.5, %v294_v48  ;;  %v332_v58 = vmul.f32 %v964_v54, %v912_v63  ;;  %v306_v50 = vmul.f32 %v910_v53, %v305_v55  ;;  %v240_v52 = vsub.f32 %v220_v35, %v898_v51  ;;  %v983_v43 = vpop.eup %583  ;;  %vm319_vm8 = vmor %vm317_vm5, %vm318_vm4 }
  0xe7   :  { %v986_v59 = vmul.f32 %v270_v46, %v241_v44  ;;  %v586_v49 = vpop.eup %585  ;;  %v342_v40 = vmul.f32 %v983_v43, %v929_v62  ;;  %v316_v35 = vmul.f32 %v915_v61, %v315_v21  ;;  %v246_v46 = vld [vmem:[%s1190_s1 + $0x28] sm:$0xff]  ;;  %vm338_vm10 = vweird.f32 %v964_v54 }
  0xe8   :  { %v296_v51 = vmul.f32 %v920_v28, %v295_v45  ;;  %v260_v33 = vadd.f32 1e-05, %v240_v52  ;;  %v333_v3 = vmul.f32 %v964_v54, %v332_v58  ;;  %v322_v56 = vmul.f32 %v586_v49, %v931_v29 }
  0xe9   :  { %403 = vperm.xlu1 %566, %v986_v59   ;;  %v310_v55 = vsel %vm309_vm3, %v910_v53, %v306_v50  ;;  %v343_v4 = vmul.f32 %v983_v43, %v342_v40  ;;  %vm328_vm6 = vweird.f32 %v586_v49  ;;  %vm337_vm11 = vweird.f32 %v912_v63 }
  0xea   :  { %v300_v27 = vsel %vm299_vm2, %v920_v28, %v296_v51  ;;  %587 = vrsqrt.f32 %v260_v33  ;;  %v323_v57 = vmul.f32 %v586_v49, %v322_v56  ;;  %v334_v44 = vmul.f32 0.5, %v333_v3  ;;  %vm329_vm9 = vmor %vm327_vm7, %vm328_vm6 }
  0xeb   :  { %v1005_v48 = vmul.f32 %v300_v27, %v244_v22  ;;  %v1009_v45 = vmul.f32 %v310_v55, %v245_v9  ;;  %v344_v58 = vmul.f32 0.5, %v343_v4  ;;  %v320_v22 = vsel %vm319_vm8, %v915_v61, %v316_v35  ;;  %vm339_vm13 = vmor %vm337_vm11, %vm338_vm10  ;;  %v250_v4 = vld [vmem:[%s1190_s1 + $0x48] sm:$0x7] }
  0xec   :  { %v324_v41 = vmul.f32 0.5, %v323_v57  ;;  %v335_v50 = vsub.f32 1.5, %v334_v44  ;;  %v366_v3 = vmul.f32 %v320_v22, %v246_v46  ;;  %vm348_vm14 = vweird.f32 %v983_v43  ;;  %v374_v22 = vld [vmem:[%s1191_s2 + $0x18] sm:$0xff] }
  0xed   :  { %418 = vperm.xlu2 %567, %v1005_v48   ;;  %v345_v29 = vsub.f32 1.5, %v344_v58  ;;  %vm357_vm15 = vweird.f32 %v260_v33  ;;  %vm347_vm2 = vweird.f32 %v929_v62  ;;  %v383_v62 = vmul.f32 %v961_v23, %v826_v15 }
  0xee   :  { %v325_v28 = vsub.f32 1.5, %v324_v41  ;;  %v336_v9 = vmul.f32 %v964_v54, %v335_v50  ;;  %vm349_vm4 = vmor %vm347_vm2, %vm348_vm14  ;;  %v249_v41 = vld [vmem:[%s1190_s1 + $0x40] sm:$0xff]  ;;  %v381_v50 = vmul.f32 %v986_v59, %v828_v16  ;;  %v372_v16 = vld [vmem:[%s1191_s2 + $0x8] sm:$0xff]  ;;  %v384_v23 = vmul.f32 %v1005_v48, %v838_v10 }
  0xef   :  { %v346_v55 = vmul.f32 %v983_v43, %v345_v29  ;;  %v386_v46 = vmul.f32 %v366_v3, %v844_v17  ;;  %v378_v29 = vld [vmem:[%s1191_s2 + $0x38] sm:$0xff] }
  0xf0   :  { %v588_v53 = vpop.eup %587  ;;  %v326_v51 = vmul.f32 %v586_v49, %v325_v28  ;;  %v340_v57 = vsel %vm339_vm13, %v964_v54, %v336_v9 }
  0xf1   :  { %v352_v52 = vmul.f32 %v588_v53, %v260_v33  ;;  %423 = vperm.xlu1 %566, %v1009_v45   ;;  %vm358_vm12 = vweird.f32 %v588_v53  ;;  %v350_v28 = vsel %vm349_vm4, %v983_v43, %v346_v55  ;;  %v371_v33 = vld [vmem:[%s1191_s2] sm:$0xff]  ;;  %v382_v43 = vmul.f32 %v966_v47, %v824_v11  ;;  %v376_v11 = vld [vmem:[%s1191_s2 + $0x28] sm:$0xff] }
  0xf2   :  { %v330_v40 = vsel %vm329_vm9, %v586_v49, %v326_v51  ;;  %v248_v49 = vld [vmem:[%s1190_s1 + $0x38] sm:$0xff]  ;;  %vm359_vm3 = vmor %vm357_vm15, %vm358_vm12  ;;  %v369_v54 = vmul.f32 %v350_v28, %v249_v41  ;;  %v385_v47 = vmul.f32 %v1009_v45, %v836_v34  ;;  %v394_v51 = vsub.f32 %v374_v22, %v384_v23  ;;  %v379_v34 = vld [vmem:[%s1191_s2 + $0x40] sm:$0xff] }
  0xf3   :  { %v353_v21 = vmul.f32 %v588_v53, %v352_v52  ;;  %v367_v27 = vmul.f32 %v330_v40, %v247_v42  ;;  %v368_v44 = vmul.f32 %v340_v57, %v248_v49  ;;  %v391_v52 = vsub.f32 %v371_v33, %v381_v50  ;;  %v375_v42 = vld [vmem:[%s1191_s2 + $0x20] sm:$0xff]  ;;  %v377_v40 = vld [vmem:[%s1191_s2 + $0x30] sm:$0xff] }
  0xf4   :  { %v392_v15 = vsub.f32 %v372_v16, %v382_v43  ;;  %v396_v10 = vsub.f32 %v376_v11, %v386_v46  ;;  %v395_v17 = vsub.f32 %v375_v42, %v385_v47 }
  0xf5   :  { %v354_v56 = vmul.f32 0.5, %v353_v21  ;;  %428 = vperm.xlu2 %567, %v366_v3   ;;  %v387_v48 = vmul.f32 %v367_v27, %v864_v60  ;;  %v389_v21 = vmul.f32 %v369_v54, %v884_v39  ;;  %v388_v45 = vmul.f32 %v368_v44, %v858_v36 }
  0xf7   :  { %v355_v61 = vsub.f32 1.5, %v354_v56  ;;  %v397_v3 = vsub.f32 %v377_v40, %v387_v48  ;;  %v399_v56 = vsub.f32 %v379_v34, %v389_v21  ;;  %v398_v60 = vsub.f32 %v378_v29, %v388_v45 }
  0xf9   :  { %433 = vperm.xlu1 %566, %v367_v27   ;;  %v356_v35 = vmul.f32 %v588_v53, %v355_v61  ;;  %v380_v27 = vld [vmem:[%s1191_s2 + $0x48] sm:$0x7] }
  0xfb   :  { %v360_v63 = vsel %vm359_vm3, %v588_v53, %v356_v35  ;;  %v373_v53 = vld [vmem:[%s1191_s2 + $0x10] sm:$0xff] }
  0xfc   :  { %v370_v58 = vmul.f32 %v360_v63, %v250_v4  ;;  %v393_v59 = vsub.f32 %v373_v53, %v383_v62 }
  0xfd   :  { %438 = vperm.xlu2 %567, %v368_v44  }
  0xfe   :  { %448 = vperm.xlu0 %568, %v370_v58   ;;  %v390_v39 = vmul.f32 %v370_v58, %v868_v5 }
 0x100   :  { %v400_v9 = vsub.f32 %v380_v27, %v390_v39 }
 0x101   :  { %443 = vperm.xlu1 %566, %v369_v54  }
 0x105   :  { %473 = vperm.xlu2 %567, %v391_v52  }
 0x106   :  { %483 = vperm.xlu0 %568, %v393_v59  }
 0x109   :  { %478 = vperm.xlu1 %566, %v392_v15  }
 0x10d   :  { %488 = vperm.xlu2 %567, %v394_v51  }
 0x10e   :  { %498 = vperm.xlu0 %568, %v396_v10  }
 0x111   :  { %493 = vperm.xlu1 %566, %v395_v17  }
 0x115   :  { %503 = vperm.xlu2 %567, %v397_v3  }
 0x116   :  { %513 = vperm.xlu0 %568, %v399_v56  }
 0x119   :  { %508 = vperm.xlu1 %566, %v398_v60  }
 0x11d   :  { %518 = vperm.xlu2 %567, %v400_v9  }
 0x13f   :  { %v409_v61 = vpop.permute.xlu2 %408 }
 0x140   :  { %v452_v47 = vmul.f32 %v409_v61, %v644_v8  ;;  %v462_v51 = vmul.f32 %v409_v61, %v676_v18 }
 0x147   :  { %v419_v36 = vpop.permute.xlu2 %418 }
 0x148   :  { %v454_v28 = vmul.f32 %v419_v36, %v639_v7 }
 0x14f   :  { %v429_v55 = vpop.permute.xlu2 %428 }
 0x150   :  { %v456_v8 = vmul.f32 %v429_v55, %v634_v6  ;;  %v466_v18 = vmul.f32 %v429_v55, %v728_v32 }
 0x156   :  { %v414_v58 = vpop.permute.xlu0 %413 }
 0x157   :  { %v1085_v49 = vpop.permute.xlu2 %438  ;;  %v453_v59 = vmul.f32 %v414_v58, %v618_v1  ;;  %v463_v42 = vmul.f32 %v414_v58, %v707_v26 }
 0x158   :  { %v458_v56 = vmul.f32 %v1085_v49, %v660_v13  ;;  %v468_v60 = vmul.f32 %v1085_v49, %v718_v30 }
 0x15b   :  { %v404_v57 = vpop.permute.xlu1 %403 }
 0x15c   :  { %v451_v4 = vmul.f32 %v404_v57, %v623_v2  ;;  %v461_v35 = vmul.f32 %v404_v57, %v681_v19  ;;  %v464_v2 = vmul.f32 %v419_v36, %v702_v25 }
 0x15f   :  { %v474_v63 = vpop.permute.xlu2 %473 }
 0x160   :  { %v521_v44 = vadd.f32 %v474_v63, %v451_v4  ;;  %v531_v5 = vadd.f32 %v474_v63, %v461_v35 }
 0x162   :  { %541 = vst.msk [vmem:[%s1192_s3] sm:$0xff] %vm34_vm0, %v521_v44 }
 0x163   :  { %v424_v41 = vpop.permute.xlu1 %423  ;;  %551 = vst.msk [vmem:[%s1192_s3 + $0x50] sm:$0xff] %vm34_vm0, %v531_v5 }
 0x164   :  { %v455_v21 = vmul.f32 %v424_v41, %v613_v0  ;;  %v465_v40 = vmul.f32 %v424_v41, %v697_v24 }
 0x167   :  { %v489_v19 = vpop.permute.xlu2 %488 }
 0x168   :  { %v524_v54 = vadd.f32 %v489_v19, %v454_v28  ;;  %v534_v50 = vadd.f32 %v489_v19, %v464_v2 }
 0x16a   :  { %544 = vst.msk [vmem:[%s1192_s3 + $0x18] sm:$0xff] %vm34_vm0, %v524_v54 }
 0x16b   :  { %v434_v62 = vpop.permute.xlu1 %433  ;;  %554 = vst.msk [vmem:[%s1192_s3 + $0x68] sm:$0xff] %vm34_vm0, %v534_v50 }
 0x16c   :  { %v457_v33 = vmul.f32 %v434_v62, %v665_v14  ;;  %v467_v7 = vmul.f32 %v434_v62, %v723_v31 }
 0x16f   :  { %v504_v25 = vpop.permute.xlu2 %503 }
 0x170   :  { %v449_v53 = vpop.permute.xlu0 %448  ;;  %v527_v43 = vadd.f32 %v504_v25, %v457_v33  ;;  %v537_v52 = vadd.f32 %v504_v25, %v467_v7 }
 0x171   :  { %v460_v14 = vmul.f32 %v449_v53, %v686_v20  ;;  %v470_v31 = vmul.f32 %v449_v53, %v741_v37 }
 0x172   :  { %547 = vst.msk [vmem:[%s1192_s3 + $0x30] sm:$0xff] %vm34_vm0, %v527_v43 }
 0x173   :  { %v444_v16 = vpop.permute.xlu1 %443  ;;  %557 = vst.msk [vmem:[%s1192_s3 + $0x80] sm:$0xff] %vm34_vm0, %v537_v52 }
 0x174   :  { %v459_v0 = vmul.f32 %v444_v16, %v655_v12  ;;  %v469_v24 = vmul.f32 %v444_v16, %v746_v38 }
 0x177   :  { %v519_v15 = vpop.permute.xlu2 %518 }
 0x178   :  { %v484_v23 = vpop.permute.xlu0 %483  ;;  %v530_v46 = vadd.f32 %v519_v15, %v460_v14  ;;  %v540_v22 = vadd.f32 %v519_v15, %v470_v31 }
 0x179   :  { %v523_v11 = vadd.f32 %v484_v23, %v453_v59  ;;  %v533_v37 = vadd.f32 %v484_v23, %v463_v42 }
 0x17a   :  { %550 = vst.msk [vmem:[%s1192_s3 + $0x48] sm:$0x7] %vm62_vm1, %v530_v46 }
 0x17b   :  { %v479_v10 = vpop.permute.xlu1 %478  ;;  %560 = vst.msk [vmem:[%s1192_s3 + $0x98] sm:$0x7] %vm62_vm1, %v540_v22 }
 0x17c   :  { %v522_v1 = vadd.f32 %v479_v10, %v452_v47  ;;  %v532_v20 = vadd.f32 %v479_v10, %v462_v51  ;;  %543 = vst.msk [vmem:[%s1192_s3 + $0x10] sm:$0xff] %vm34_vm0, %v523_v11 }
 0x17d   :  { %553 = vst.msk [vmem:[%s1192_s3 + $0x60] sm:$0xff] %vm34_vm0, %v533_v37 }
 0x17e   :  { %542 = vst.msk [vmem:[%s1192_s3 + $0x8] sm:$0xff] %vm34_vm0, %v522_v1 }
 0x17f   :  { %552 = vst.msk [vmem:[%s1192_s3 + $0x58] sm:$0xff] %vm34_vm0, %v532_v20 }
 0x180   :  { %v499_v26 = vpop.permute.xlu0 %498 }
 0x181   :  { %v526_v17 = vadd.f32 %v499_v26, %v456_v8  ;;  %v536_v48 = vadd.f32 %v499_v26, %v466_v18 }
 0x183   :  { %v494_v6 = vpop.permute.xlu1 %493  ;;  %546 = vst.msk [vmem:[%s1192_s3 + $0x28] sm:$0xff] %vm34_vm0, %v526_v17 }
 0x184   :  { %v525_v32 = vadd.f32 %v494_v6, %v455_v21  ;;  %v535_v34 = vadd.f32 %v494_v6, %v465_v40  ;;  %556 = vst.msk [vmem:[%s1192_s3 + $0x78] sm:$0xff] %vm34_vm0, %v536_v48 }
 0x186   :  { %545 = vst.msk [vmem:[%s1192_s3 + $0x20] sm:$0xff] %vm34_vm0, %v525_v32 }
 0x187   :  { %555 = vst.msk [vmem:[%s1192_s3 + $0x70] sm:$0xff] %vm34_vm0, %v535_v34 }
 0x188   :  { %v514_v45 = vpop.permute.xlu0 %513 }
 0x189   :  { %v529_v29 = vadd.f32 %v514_v45, %v459_v0  ;;  %v539_v3 = vadd.f32 %v514_v45, %v469_v24 }
 0x18b   :  { %v509_v39 = vpop.permute.xlu1 %508  ;;  %549 = vst.msk [vmem:[%s1192_s3 + $0x40] sm:$0xff] %vm34_vm0, %v529_v29 }
 0x18c   :  { %v528_v12 = vadd.f32 %v509_v39, %v458_v56  ;;  %v538_v38 = vadd.f32 %v509_v39, %v468_v60  ;;  %559 = vst.msk [vmem:[%s1192_s3 + $0x90] sm:$0xff] %vm34_vm0, %v539_v3 }
 0x18e   :  { %548 = vst.msk [vmem:[%s1192_s3 + $0x38] sm:$0xff] %vm34_vm0, %v528_v12 }
 0x18f   :  { %558 = vst.msk [vmem:[%s1192_s3 + $0x88] sm:$0xff] %vm34_vm0, %v538_v38 }

</bundles_post_ra>
